<compile_context>
chip_gen: v5e
topology: v5e:2x2
jax: 0.10.0
libtpu: 0.0.40
codegen_flags: <defaults>
</compile_context>

<pallas_src>
import math

import jax
import jax.numpy as jnp
import numpy as np
from jax.experimental import pallas as pl
from jax.experimental.pallas import tpu as pltpu


# ----------------------------------------------------------------------------
# Tile pickers (respect the (8, 128) layout constraint).
# ----------------------------------------------------------------------------
def _fit_lane_tile(dim, pref):
    """Tile for a lane (last) dim: multiple of 128 or the full dim."""
    for t in (pref, 512, 256, 128):
        if t <= dim and dim % t == 0:
            return t
    return dim


def _fit_sublane_tile(dim, pref):
    """Tile for a sublane (second-to-last) dim: multiple of 8 or the full dim."""
    for t in (pref, 512, 256, 128, 64, 32, 16, 8):
        if t <= dim and dim % t == 0:
            return t
    return dim


# ----------------------------------------------------------------------------
# Kernel 1: tiled linear  y = x @ W + b  (fused QKV projection uses W=(E,3E)).
# ----------------------------------------------------------------------------
def _linear_kernel(x_ref, w_ref, b_ref, o_ref, acc_ref):
    @pl.when(pl.program_id(2) == 0)
    def _init():
        acc_ref[...] = jnp.zeros_like(acc_ref)

    acc_ref[...] += jnp.dot(x_ref[...], w_ref[...],
                            preferred_element_type=jnp.float32)

    @pl.when(pl.program_id(2) == pl.num_programs(2) - 1)
    def _finalize():
        o_ref[...] = (acc_ref[...] + b_ref[...].astype(jnp.float32)).astype(o_ref.dtype)


def linear(x2d, w, b, *, tm=256, tn=256, tk=512):
    """x2d:(M,K), w:(K,N), b:(1,N) -> (M,N). Tiled matmul + bias."""
    M, K = x2d.shape
    Kw, N = w.shape
    assert K == Kw and b.shape == (1, N)
    tm = _fit_sublane_tile(M, tm)
    tn = _fit_lane_tile(N, tn)
    tk = _fit_lane_tile(K, tk)      # K is lane dim of x AND sublane dim of w
    grid = (M // tm, N // tn, K // tk)
    return pl.pallas_call(
        _linear_kernel,
        out_shape=jax.ShapeDtypeStruct((M, N), x2d.dtype),
        grid_spec=pltpu.PrefetchScalarGridSpec(
            num_scalar_prefetch=0,
            grid=grid,
            in_specs=[pl.BlockSpec((tm, tk), lambda i, j, k: (i, k)),
                      pl.BlockSpec((tk, tn), lambda i, j, k: (k, j)),
                      pl.BlockSpec((1, tn), lambda i, j, k: (0, j))],
            out_specs=pl.BlockSpec((tm, tn), lambda i, j, k: (i, j)),
            scratch_shapes=[pltpu.VMEM((tm, tn), jnp.float32)]),
        compiler_params=pltpu.CompilerParams(
            dimension_semantics=("parallel", "parallel", "arbitrary")),
    )(x2d, w, b)


# ----------------------------------------------------------------------------
# Kernel 2: flash-attention SDPA, gridded over (batch, head, q_tile, kv_tile).
#   Kernel-view shapes (singleton dims squeezed by the BlockSpecs):
#     q_ref:(tq,D)  k_ref,v_ref:(tkv,D)  mask_ref:(tq,tkv)  o_ref:(tq,D)
#   Scratch: m,l:(tq,1) f32, acc:(tq,D) f32 (online softmax state).
# ----------------------------------------------------------------------------
def _flash_attn_kernel(q_ref, k_ref, v_ref, mask_ref, o_ref, m_sc, l_sc, acc_sc):
    kv = pl.program_id(3)

    @pl.when(kv == 0)
    def _init():
        m_sc[...] = jnp.full_like(m_sc, -jnp.inf)
        l_sc[...] = jnp.zeros_like(l_sc)
        acc_sc[...] = jnp.zeros_like(acc_sc)

    d_k = q_ref.shape[-1]
    scale = 1.0 / math.sqrt(d_k)
    # Fold the 1/sqrt(d_k) scale into q ((tq*D) work instead of a (tq*tkv)
    # scale on the scores), keeping the operand dtype for the fast MXU path.
    q = q_ref[...] * jnp.asarray(scale, q_ref.dtype)
    # q @ k^T as an "nt" dot_general -> no explicit k transpose/relayout.
    s = jax.lax.dot_general(q, k_ref[...], (((1,), (1,)), ((), ())),
                            preferred_element_type=jnp.float32)
    s = s + mask_ref[...].astype(jnp.float32)

    m_prev = m_sc[...]
    m_new = jnp.maximum(m_prev, jnp.max(s, axis=-1, keepdims=True))
    alpha = jnp.exp(m_prev - m_new)
    p = jnp.exp(s - m_new)
    l_sc[...] = alpha * l_sc[...] + jnp.sum(p, axis=-1, keepdims=True)
    acc_sc[...] = alpha * acc_sc[...] + jnp.dot(
        p.astype(v_ref.dtype), v_ref[...], preferred_element_type=jnp.float32)
    m_sc[...] = m_new

    @pl.when(kv == pl.num_programs(3) - 1)
    def _finalize():
        # Reciprocal (EUP) + multiply instead of an element-wise divide.
        inv_l = pl.reciprocal(l_sc[...], approx=False)
        o_ref[...] = (acc_sc[...] * inv_l).astype(o_ref.dtype)


def _pick_kv_tile(seq_len):
    for t in (512, 256, 128):
        if seq_len % t == 0:
            return t
    return seq_len


def _pick_q_tile(seq_len):
    for t in (256, 128, 64, 32, 16, 8):
        if seq_len % t == 0:
            return t
    return seq_len


def attention(q_src, kv_src, mask, num_heads, head_dim, *,
              q_off, k_off, v_off):
    """Scaled-dot-product attention over fused projection outputs.

    q_src:  (B, S, Eq)  -- queries live in columns [q_off*D, (q_off+H)*D)
    kv_src: (B, S, Ekv) -- keys   live in columns [k_off*D, (k_off+H)*D)
                           values live in columns [v_off*D, (v_off+H)*D)
    mask:   (B, S, S) additive, broadcast over heads.
    Returns (B, S, H*D).
    """
    B, S, _ = q_src.shape
    H, D = num_heads, head_dim
    E = H * D
    tkv = _pick_kv_tile(S)
    tq = _pick_q_tile(S)
    grid = (B, H, S // tq, S // tkv)
    scratch = [pltpu.VMEM((tq, 1), jnp.float32),
               pltpu.VMEM((tq, 1), jnp.float32),
               pltpu.VMEM((tq, D), jnp.float32)]
    mask_spec = pl.BlockSpec((None, tq, tkv), lambda b, h, qi, kv: (b, qi, kv))
    cparams = pltpu.CompilerParams(
        dimension_semantics=("parallel", "parallel", "parallel", "arbitrary"))

    if D % 128 == 0:
        # Fast path: slice each head straight out of the fused projection
        # outputs via BlockSpec block offsets (all lane offsets are
        # 128-aligned) and write a lane-dense (B, S, E) output slab ->
        # no host-side column slices, no split/merge-heads transposes.
        q_spec = pl.BlockSpec((None, tq, D),
                              lambda b, h, qi, kv: (b, qi, q_off + h))
        k_spec = pl.BlockSpec((None, tkv, D),
                              lambda b, h, qi, kv: (b, kv, k_off + h))
        v_spec = pl.BlockSpec((None, tkv, D),
                              lambda b, h, qi, kv: (b, kv, v_off + h))
        out_spec = pl.BlockSpec((None, tq, D),
                                lambda b, h, qi, kv: (b, qi, h))
        return pl.pallas_call(
            _flash_attn_kernel,
            out_shape=jax.ShapeDtypeStruct((B, S, E), q_src.dtype),
            grid_spec=pltpu.PrefetchScalarGridSpec(
                num_scalar_prefetch=0, grid=grid,
                in_specs=[q_spec, k_spec, v_spec, mask_spec],
                out_specs=out_spec,
                scratch_shapes=scratch),
            compiler_params=cparams,
        )(q_src, kv_src, kv_src, mask)

    # Fallback (head_dim not 128-aligned): explicit (B, H, S, D) layout.
    # TODO(synk): lane width D < 128 here means masked partial stores; a
    # multi-head-per-block layout would restore lane-dense writes.
    q2d = q_src[..., q_off * D:(q_off + H) * D]
    k2d = kv_src[..., k_off * D:(k_off + H) * D]
    v2d = kv_src[..., v_off * D:(v_off + H) * D]

    def split_heads(t):
        return t.reshape(B, S, H, D).transpose(0, 2, 1, 3)

    q4, k4, v4 = split_heads(q2d), split_heads(k2d), split_heads(v2d)
    q_spec = pl.BlockSpec((None, None, tq, D), lambda b, h, qi, kv: (b, h, qi, 0))
    kv_spec = pl.BlockSpec((None, None, tkv, D), lambda b, h, qi, kv: (b, h, kv, 0))
    out_spec = pl.BlockSpec((None, None, tq, D), lambda b, h, qi, kv: (b, h, qi, 0))
    out = pl.pallas_call(
        _flash_attn_kernel,
        out_shape=jax.ShapeDtypeStruct((B, H, S, D), q_src.dtype),
        grid_spec=pltpu.PrefetchScalarGridSpec(
            num_scalar_prefetch=0, grid=grid,
            in_specs=[q_spec, kv_spec, kv_spec, mask_spec],
            out_specs=out_spec,
            scratch_shapes=scratch),
        compiler_params=cparams,
    )(q4, k4, v4, mask)
    return out.transpose(0, 2, 1, 3).reshape(B, S, E)


# ----------------------------------------------------------------------------
# Forward pass (mirrors MultiHeadAttention.forward).
# ----------------------------------------------------------------------------
def multi_head_attention_forward(params, cur_encoding, mask, num_heads,
                                 cross_encoding=None):
    B, S, E = cur_encoding.shape
    H = num_heads
    D = E // H
    x_kv = cur_encoding.reshape(B * S, E)
    w, b = params["w_qkv"], params["b_qkv"]

    if cross_encoding is None:
        # One fused (E, 3E) projection: single pass over x; the attention
        # kernel reads q/k/v heads straight out of the fused output.
        qkv = linear(x_kv, w, b).reshape(B, S, 3 * E)        # (B, S, 3E)
        return attention(qkv, qkv, mask, H, D,
                         q_off=0, k_off=H, v_off=2 * H)
    else:
        # Cross-attention: compute only what is needed (q from cross, kv from cur).
        x_q = cross_encoding.reshape(B * S, E)
        q3 = linear(x_q, w[:, :E], b[:, :E]).reshape(B, S, E)       # q-only
        kv3 = linear(x_kv, w[:, E:], b[:, E:]).reshape(B, S, 2 * E)  # fused k+v
        return attention(q3, kv3, mask, H, D,
                         q_off=0, k_off=0, v_off=H)
    # NOTE: the PyTorch forward() never applies last_linear_layer, so neither do we.


# ----------------------------------------------------------------------------
# Deterministic parameter init (mirrors nn.Linear default: U(-1/sqrt(in), ..)).
# Weights stored as (in, out) = torch_weight.T and fused into (E, 3E) / (1, 3E).
# ----------------------------------------------------------------------------
def init_params(key, embedding_dimension):
    E = embedding_dimension
    bound = 1.0 / math.sqrt(E)
    keys = jax.random.split(key, 6)

    def u(k, shape):
        return jax.random.uniform(k, shape, jnp.float32, -bound, bound)

    wq, wk, wv = u(keys[0], (E, E)), u(keys[1], (E, E)), u(keys[2], (E, E))
    bq, bk, bv = u(keys[3], (1, E)), u(keys[4], (1, E)), u(keys[5], (1, E))
    # last_linear_layer params exist in the torch __init__ but are unused in forward().
    return {"w_qkv": jnp.concatenate([wq, wk, wv], axis=1),
            "b_qkv": jnp.concatenate([bq, bk, bv], axis=1)}


# ----------------------------------------------------------------------------
# Pure-JAX reference (for correctness check).
# ----------------------------------------------------------------------------
def reference_forward(params, cur, mask, num_heads, cross=None):
    B, S, E = cur.shape
    D = E // num_heads
    w, b = params["w_qkv"], params["b_qkv"]
    x_q = cur if cross is None else cross
    q = x_q @ w[:, :E] + b[:, :E]
    k = cur @ w[:, E:2 * E] + b[:, E:2 * E]
    v = cur @ w[:, 2 * E:] + b[:, 2 * E:]

    def split(t):
        return t.reshape(B, S, num_heads, D).transpose(0, 2, 1, 3)

    q, k, v = split(q), split(k), split(v)
    scores = jnp.einsum("bhqd,bhkd->bhqk", q, k) / math.sqrt(D)
    scores = scores + mask[:, None, :, :]
    p = jax.nn.softmax(scores, axis=-1)
    out = jnp.einsum("bhqk,bhkd->bhqd", p, v)
    return out.transpose(0, 2, 1, 3).reshape(B, S, E)


if __name__ == "__main__":
    def run_case(B, S, E, H, use_cross):
        key = jax.random.PRNGKey(0)
        kp, kx, kc = jax.random.split(key, 3)
        params = init_params(kp, E)
        cur = jax.random.normal(kx, (B, S, E), jnp.float32)
        cross = jax.random.normal(kc, (B, S, E), jnp.float32) if use_cross else None
        # additive mask: 0 = keep, -1e9 = masked (causal mask per batch)
        causal = jnp.tril(jnp.ones((S, S), jnp.float32))
        mask = jnp.where(causal > 0, 0.0, -1e9)[None].repeat(B, axis=0)  # (B,S,S)

        out = multi_head_attention_forward(params, cur, mask, H, cross)
        out = jax.block_until_ready(out)
        ref = reference_forward(params, cur, mask, H, cross)
        np.testing.assert_allclose(np.asarray(out), np.asarray(ref),
                                   rtol=2e-5, atol=2e-5)

    # Fast path: head_dim = 128 -> heads sliced from fused QKV by BlockSpec,
    # no host-side column slices or head transposes.
    run_case(B=2, S=8, E=256, H=2, use_cross=False)
    # Cross-attention branch (q from cross_encoding, k/v fused from cur_encoding).
    run_case(B=2, S=8, E=256, H=2, use_cross=True)
    # Fallback path: head_dim = 8 (< 128) -> (B, H, S, D) layout.
    run_case(B=2, S=8, E=32, H=4, use_cross=False)

    print("KERNEL_OK")
</pallas_src>

<mosaic_0001>
module attributes {stable_mosaic.version = 11 : i64} {
  func.func @_linear_kernel(%arg0: i32, %arg1: i32, %arg2: i32, %arg3: memref<16x256xf32, #tpu.memory_space<vmem>>, %arg4: memref<256x256xf32, #tpu.memory_space<vmem>>, %arg5: memref<1x256xf32, #tpu.memory_space<vmem>>, %arg6: memref<16x256xf32, #tpu.memory_space<vmem>>, %arg7: memref<16x256xf32, #tpu.memory_space<vmem>>) attributes {dimension_semantics = [#tpu.dimension_semantics<parallel>, #tpu.dimension_semantics<parallel>, #tpu.dimension_semantics<arbitrary>], iteration_bounds = array<i64: 1, 3, 1>, scalar_prefetch = 0 : i64, scratch_operands = 1 : i64, tpu.core_type = #tpu.core_type<tc>, window_params = [{transform_indices = @transform_0, window_bounds = array<i64: 16, 256>}, {transform_indices = @transform_1, window_bounds = array<i64: 256, 256>}, {transform_indices = @transform_2, window_bounds = array<i64: 1, 256>}, {transform_indices = @transform_3, window_bounds = array<i64: 16, 256>}]} {
    %c0_i32 = arith.constant 0 : i32
    %0 = arith.cmpi eq, %arg2, %c0_i32 : i32
    %1 = arith.extui %0 : i1 to i32
    %c0_i32_0 = arith.constant 0 : i32
    %2 = arith.cmpi ne, %1, %c0_i32_0 : i32
    scf.if %2 {
      %cst_10 = arith.constant 0.000000e+00 : f32
      %12 = vector.broadcast %cst_10 : f32 to vector<16x256xf32>
      %c0_11 = arith.constant 0 : index
      %c0_12 = arith.constant 0 : index
      %13 = vector.load %arg7[%c0_11, %c0_12] : memref<16x256xf32, #tpu.memory_space<vmem>>, vector<16x256xf32>
      tpu.vector_store %arg7[%c0_11, %c0_12], %12 {strides = array<i32>} : memref<16x256xf32, #tpu.memory_space<vmem>>, vector<16x256xf32>,
    } else {
    }
    %c0 = arith.constant 0 : index
    %c0_1 = arith.constant 0 : index
    %3 = vector.load %arg7[%c0, %c0_1] : memref<16x256xf32, #tpu.memory_space<vmem>>, vector<16x256xf32>
    %c0_2 = arith.constant 0 : index
    %c0_3 = arith.constant 0 : index
    %4 = vector.load %arg3[%c0_2, %c0_3] : memref<16x256xf32, #tpu.memory_space<vmem>>, vector<16x256xf32>
    %c0_4 = arith.constant 0 : index
    %c0_5 = arith.constant 0 : index
    %5 = vector.load %arg4[%c0_4, %c0_5] : memref<256x256xf32, #tpu.memory_space<vmem>>, vector<256x256xf32>
    %cst = arith.constant dense<0.000000e+00> : vector<16x256xf32>
    %6 = tpu.matmul %4, %5, %cst {dimension_numbers = #tpu.dot_dimension_numbers<[1], [0], [0], [1], [0, 0, 1, 1], [], []>} : vector<16x256xf32>, vector<256x256xf32>, vector<16x256xf32> -> vector<16x256xf32>
    %7 = arith.addf %3, %6 : vector<16x256xf32>
    %c0_6 = arith.constant 0 : index
    %c0_7 = arith.constant 0 : index
    %8 = vector.load %arg7[%c0_6, %c0_7] : memref<16x256xf32, #tpu.memory_space<vmem>>, vector<16x256xf32>
    tpu.vector_store %arg7[%c0_6, %c0_7], %7 {strides = array<i32>} : memref<16x256xf32, #tpu.memory_space<vmem>>, vector<16x256xf32>,
    %c0_i32_8 = arith.constant 0 : i32
    %9 = arith.cmpi eq, %arg2, %c0_i32_8 : i32
    %10 = arith.extui %9 : i1 to i32
    %c0_i32_9 = arith.constant 0 : i32
    %11 = arith.cmpi ne, %10, %c0_i32_9 : i32
    scf.if %11 {
      %c0_10 = arith.constant 0 : index
      %c0_11 = arith.constant 0 : index
      %12 = vector.load %arg7[%c0_10, %c0_11] : memref<16x256xf32, #tpu.memory_space<vmem>>, vector<16x256xf32>
      %c0_12 = arith.constant 0 : index
      %c0_13 = arith.constant 0 : index
      %13 = vector.load %arg5[%c0_12, %c0_13] : memref<1x256xf32, #tpu.memory_space<vmem>>, vector<1x256xf32>
      %14 = vector.broadcast %13 : vector<1x256xf32> to vector<16x256xf32>
      %15 = arith.addf %12, %14 : vector<16x256xf32>
      %c0_14 = arith.constant 0 : index
      %c0_15 = arith.constant 0 : index
      %16 = vector.load %arg6[%c0_14, %c0_15] : memref<16x256xf32, #tpu.memory_space<vmem>>, vector<16x256xf32>
      tpu.vector_store %arg6[%c0_14, %c0_15], %15 {strides = array<i32>} : memref<16x256xf32, #tpu.memory_space<vmem>>, vector<16x256xf32>,
    } else {
    }
    return
  }
  func.func @transform_0(%arg0: i32, %arg1: i32, %arg2: i32) -> (i32, i32) {
    %c0_i32 = arith.constant 0 : i32
    return %arg0, %arg2 : i32, i32
  }
  func.func @transform_1(%arg0: i32, %arg1: i32, %arg2: i32) -> (i32, i32) {
    %c0_i32 = arith.constant 0 : i32
    return %arg2, %arg1 : i32, i32
  }
  func.func @transform_2(%arg0: i32, %arg1: i32, %arg2: i32) -> (i32, i32) {
    %c0_i32 = arith.constant 0 : i32
    %c0_i32_0 = arith.constant 0 : i32
    return %c0_i32, %arg1 : i32, i32
  }
  func.func @transform_3(%arg0: i32, %arg1: i32, %arg2: i32) -> (i32, i32) {
    %c0_i32 = arith.constant 0 : i32
    return %arg0, %arg1 : i32, i32
  }
}

</mosaic_0001>

<bundles_post_ra>
// kernel: tpu_custom_call.1
= control target key start
LH: loop header
LB: loop body
LE: loop exit
PB: predicated region body
PF: predicated region fallthrough
CT: control target
= control target key end

     0   :  { %s1189_s0 = inlined_call_operand.hbm [shape: f32[16,256], index: 0, kind: input, shape index: {}]   ;;  %s1190_s1 = inlined_call_operand.hbm [shape: f32[256,768], index: 1, kind: input, shape index: {}]   ;;  %s1191_s2 = inlined_call_operand.hbm [shape: f32[1,768], index: 2, kind: input, shape index: {}]   ;;  %s1192_s3 = inlined_call_operand.hbm [shape: f32[16,768], index: 3, kind: output, shape index: {}]  }
   0x1   :  { %1195 = sst [smem:[#allocation13_spill]] %s1189_s0 }
   0x2   :  { %1196 = sst [smem:[#allocation14_spill]] %s1190_s1 }
   0x3   :  { %8 = vsyncpa [#allocation4], 0 }
   0x4   :  { %9 = vsyncpa [#allocation7], 0 }
   0x5   :  { %11 = vsyncpa [#allocation7 + $0x1], 0 }
   0x6   :  { %12 = vsyncpa [#allocation5], 0 }
   0x7   :  { %14 = vsyncpa [#allocation5 + $0x1], 0  ;;  %s948_s12 = smov 0   ;;  %s950_s13 = smov 0  }
   0x8   :  { %s952_s14 = smov 0   ;;  %s954_s15 = smov 0  }
   0x9   :  { %s956_s16 = smov 0   ;;  %s958_s17 = smov 0  }
   0xa LB: > { %s35_s18 = sadd.s32 1, %s915_s16  ;;  %s76_s19 = sadd.s32 1, %s907_s14  ;;  %s919_s17 = sphi %s958_s17, %s20_s17   ;;  %s915_s16 = sphi %s956_s16, %s1211_s16   ;;  %s911_s15 = sphi %s954_s15, %s1210_s15   ;;  %s907_s14 = sphi %s952_s14, %s1209_s14   ;;  %s903_s13 = sphi %s950_s13, %s1208_s13   ;;  %s899_s12 = sphi %s948_s12, %s1207_s12  }
   0xb   : > { %p37_p0 = scmp.ge.s32.totalorder %s35_s18, 3  ;;  %p83_p1 = scmp.ne.s32.totalorder %s907_s14, %s903_s13 }
   0xc   : > { %p84_p2 = scmp.eq.s32.totalorder %s919_s17, 0  ;;  %p685_p5 = scmp.lt.s32.totalorder %s919_s17, 3 }
   0xd   : > { %s1213_s18 = smov (%p37_p0, %s35_s18), 0  ;;  %s187_s22 = sand.u32 1, %s919_s17  }
   0xe   : > { %p988_p3 = por %p84_p2, %p83_p1  ;;  %s72_s21 = ssub.s32 %s915_s16, %s1213_s18 }
   0xf   : > { %p74_p4 = scmp.eq.s32.totalorder %s72_s21, 0  ;;  %s189_s23 = sand.u32 1, %s907_s14  }
  0x10   : > { %s642_s25 = sshll.u32 %s189_s23, 9  ;;  %s657_s26 = sshll.u32 %s915_s16, 4 }
  0x11   : > { %s998_s24 = scalar_select %p74_p4, %s907_s14, %s76_s19  }
  0x12   : > { %s1198_s1 = sld [smem:[#allocation14_spill]]  ;;  %s191_s30 = scalar_lea.vmem [#allocation6], %s642_s25 }
  0x13   : > { %s202_s4 = sshll.u32 %s191_s30, 4  ;;  %p1008_p6 = pnand %p685_p5, %p988_p3  ;;  %s203_s4 = int_to_ptr.vmem [resolvable:$true] %s202_s4 }
  0x14   : > { %s1012_s7 = scalar_lea.sflag [#allocation7], %s187_s22  ;;  %s921_s8 = smov 768  }
  0x15   : > { %s1193_s9 = smov 256   ;;  %s1194_s10 = smov 16  }
  0x16   : > { %s1020_s11 = sadd.s32 4294967295, %s919_s17   ;;  %s638_s19 = sadd.s32 4294967294, %s919_s17  }
  0x17   : > { %p89_p7 = scmp.ne.s32.totalorder %s903_s13, %s899_s12  ;;  %p90_p8 = scmp.eq.s32.totalorder %s1020_s11, 0 }
  0x18   : > { %s199_s29 = scalar_lea.hbm %s1198_s1, %s657_s26  ;;  %p141_p9 = scmp.eq.s32.totalorder %s1020_s11, 2 }
  0x19   : > { %s200_s5 = sshll.u32 %s199_s29, 4  ;;  %p147_p10 = scmp.eq.s32.totalorder %s638_s19, 2  ;;  %s201_s5 = int_to_ptr.hbm [resolvable:$true] %s200_s5 }
  0x1a   : > { %676 = dma.hbm_to_vmem [thread:$0]  (!%p1008_p6), %s201_s5, 8192, %s203_s4, %s1012_s7, %s921_s8, %s1193_s9, %s1194_s10  }
  0x1b   : > { %p1029_p11 = por %p90_p8, %p89_p7  ;;  %p639_p12 = scmp.ge.s32.totalorder %s919_s17, 1 }
  0x1c   : > { %p1037_p13 = por %p141_p9, %p83_p1  ;;  %p1041_p0 = por %p147_p10, %p89_p7 }
  0x1d   : > { %p154_p2 = scmp.lt.s32.totalorder %s919_s17, 4  ;;  %s1203_s0 = sld [smem:[#allocation13_spill]] }
  0x1e   : > { %s924_s29 = smov [#allocation3]   ;;  %s645_s4 = sshll.u32 %s189_s23, 1 }
  0x1f   : > { %p1049_p3 = pnand %p639_p12, %p154_p2  ;;  %s173_s30 = sshll.u32 %s924_s29, 4  ;;  %s174_s30 = int_to_ptr.vmem [resolvable:$true] %s173_s30 }
  0x20   : > { %s646_s5 = sshll.u32 %s915_s16, 1  ;;  %s216_s9 = scalar_lea.vmem [#allocation8], %s645_s4 }
  0x21   : > { %p669_p1 = pneg %p1049_p3  ;;  %s220_s25 = scalar_lea.hbm %s1191_s2, %s646_s5 }
  0x22   : > { %s222_s26 = sshll.u32 %s220_s25, 4  ;;  %s224_s10 = sshll.u32 %s216_s9, 4  ;;  %s223_s26 = int_to_ptr.hbm [resolvable:$true] %s222_s26  ;;  %s225_s10 = int_to_ptr.vmem [resolvable:$true] %s224_s10 }
  0x23   : > { %s171_s27 = sshll.u32 %s1203_s0, 4  ;;  %p670_p4 = pnand %p669_p1, %p90_p8  ;;  %s172_s27 = int_to_ptr.hbm [resolvable:$true] %s171_s27 }
  0x24   : > { %s1205_s0 = smov 16   ;;  %s1206_s1 = smov 256  }
  0x25   : > { %672 = dma.hbm_to_vmem [thread:$0]  (!%p670_p4), %s172_s27, 512, %s174_s30, [#allocation4], %s1206_s1, %s1206_s1, %s1205_s0  }
  0x26   : > { %679 = dma.hbm_to_vmem [thread:$0]  (!%p1008_p6), %s223_s26, 32, %s225_s10, %s1012_s7  }
  0x27   : > { %233 = sbr.rel (%p1049_p3) target bundleno = 231 (0xe7), region = 32 }
  0x2c   : > { %886 = dma.done.wait (%p90_p8), [#allocation4], 512  }
  0x2d   : > { %888 = vsyncadd (%p90_p8), [#allocation4], 4294966784  ;;  %s240_s23 = sand.u32 1, %s1020_s11   ;;  %s1077_s9 = sand.u32 1, %s903_s13  }
  0x2e   : > { %s649_s0 = sshll.u32 %s1077_s9, 9  ;;  %s241_s1 = scalar_lea.sflag [#allocation7], %s240_s23 }
  0x2f   : > { %s1080_s6 = scalar_lea.vmem [#allocation6], %s649_s0 }
  0x30   : > { %890 = dma.done.wait (%p1029_p11), %s241_s1, 8224  }
  0x31   : > { %892 = vsyncadd (%p1029_p11), %s241_s1, 4294959072  ;;  %v337_v0 = vld [vmem:[%s1080_s6 + $0xf8] sm:$0xff]  ;;  %v335_v2 = vld [vmem:[%s1080_s6 + $0xe8] sm:$0xff]  ;;  %s650_s7 = sshll.u32 %s1077_s9, 1  ;;  %s651_s11 = sshll.u32 %s1077_s9, 5 }
  0x32   : > { %v369_v1 = vld [vmem:[%s1080_s6 + $0x1f8] sm:$0xff]  ;;  %416 = vmatpush.msra.mxu2 %v337_v0  ;;  %v367_v3 = vld [vmem:[%s1080_s6 + $0x1e8] sm:$0xff]  ;;  %v336_v6 = vld [vmem:[%s1080_s6 + $0xf0] sm:$0xff]  ;;  %s254_s10 = scalar_lea.vmem [#allocation8], %s650_s7  ;;  %s658_s20 = sshll.u32 %s911_s15, 4 }
  0x33   : > { %439 = vmatpush.msra.mxu3 %v369_v1  ;;  %v333_v4 = vld [vmem:[%s1080_s6 + $0xd8] sm:$0xff]  ;;  %v368_v7 = vld [vmem:[%s1080_s6 + $0x1f0] sm:$0xff]  ;;  %v334_v8 = vld [vmem:[%s1080_s6 + $0xe0] sm:$0xff]  ;;  %370 = vmatpush.msra.mxu0 %v336_v6  ;;  %s282_s27 = scalar_lea.vmem [#allocation9], %s651_s11  ;;  %s506_s30 = scalar_lea.hbm %s1192_s3, %s658_s20 }
  0x34   : > { %v365_v5 = vld [vmem:[%s1080_s6 + $0x1d8] sm:$0xff]  ;;  %417 = vmatpush.msra.mxu2 %v335_v2  ;;  %v366_v9 = vld [vmem:[%s1080_s6 + $0x1e0] sm:$0xff]  ;;  %393 = vmatpush.msra.mxu1 %v368_v7  ;;  %v331_v10 = vld [vmem:[%s1080_s6 + $0xc8] sm:$0xff]  ;;  %s507_s4 = sshll.u32 %s282_s27, 4  ;;  %s509_s5 = sshll.u32 %s506_s30, 4  ;;  %s508_s4 = int_to_ptr.vmem [resolvable:$true] %s507_s4  ;;  %s510_s5 = int_to_ptr.hbm [resolvable:$true] %s509_s5 }
  0x35   : > { %440 = vmatpush.msra.mxu3 %v367_v3  ;;  %v363_v11 = vld [vmem:[%s1080_s6 + $0x1c8] sm:$0xff]  ;;  %v332_v12 = vld [vmem:[%s1080_s6 + $0xd0] sm:$0xff]  ;;  %371 = vmatpush.msra.mxu0 %v334_v8  ;;  %v329_v14 = vld [vmem:[%s1080_s6 + $0xb8] sm:$0xff]  ;;  %s492_s15 = scalar_lea.sflag [#allocation5], %s1077_s9  ;;  %s847_s8 = sshra.s32 %s510_s5, 4  ;;  %s848_s8 = int_to_ptr.hbm [resolvable:$true] %s847_s8 }
  0x36   : > { %418 = vmatpush.msra.mxu2 %v333_v4  ;;  %v364_v13 = vld [vmem:[%s1080_s6 + $0x1d0] sm:$0xff]  ;;  %394 = vmatpush.msra.mxu1 %v366_v9  ;;  %v361_v15 = vld [vmem:[%s1080_s6 + $0x1b8] sm:$0xff]  ;;  %v330_v16 = vld [vmem:[%s1080_s6 + $0xc0] sm:$0xff]  ;;  %s849_s19 = scalar_lea.hbm %s848_s8, 32  ;;  %s853_s23 = scalar_lea.hbm %s1192_s3, 96 }
  0x37   : > { %441 = vmatpush.msra.mxu3 %v365_v5  ;;  %v362_v17 = vld [vmem:[%s1080_s6 + $0x1c0] sm:$0xff]  ;;  %372 = vmatpush.msra.mxu0 %v332_v12  ;;  %v327_v18 = vld [vmem:[%s1080_s6 + $0xa8] sm:$0xff]  ;;  %v328_v20 = vld [vmem:[%s1080_s6 + $0xb0] sm:$0xff]  ;;  %p850_p5 = scmp.ne.s32.totalorder %s848_s8, %s849_s19  ;;  %p854_p8 = scmp.lt.s32.totalorder %s848_s8, %s1192_s3 }
  0x38   : > { %419 = vmatpush.msra.mxu2 %v331_v10  ;;  %395 = vmatpush.msra.mxu1 %v364_v13  ;;  %v359_v19 = vld [vmem:[%s1080_s6 + $0x1a8] sm:$0xff]  ;;  %v360_v21 = vld [vmem:[%s1080_s6 + $0x1b0] sm:$0xff]  ;;  %v325_v22 = vld [vmem:[%s1080_s6 + $0x98] sm:$0xff]  ;;  %p855_p9 = scmp.lt.s32.totalorder %s853_s23, %s849_s19 }
  0x39   : > { %442 = vmatpush.msra.mxu3 %v363_v11  ;;  %373 = vmatpush.msra.mxu0 %v330_v16  ;;  %v357_v23 = vld [vmem:[%s1080_s6 + $0x198] sm:$0xff]  ;;  %v326_v24 = vld [vmem:[%s1080_s6 + $0xa0] sm:$0xff]  ;;  %v323_v26 = vld [vmem:[%s1080_s6 + $0x88] sm:$0xff]  ;;  %p851_p6 = pnand %p850_p5, %p1037_p13 }
  0x3a   : > { %420 = vmatpush.msra.mxu2 %v329_v14  ;;  %396 = vmatpush.msra.mxu1 %v362_v17  ;;  %v358_v25 = vld [vmem:[%s1080_s6 + $0x1a0] sm:$0xff]  ;;  %v355_v27 = vld [vmem:[%s1080_s6 + $0x188] sm:$0xff]  ;;  %v324_v28 = vld [vmem:[%s1080_s6 + $0x90] sm:$0xff]  ;;  %p856_p10 = por %p855_p9, %p854_p8 }
  0x3b   : > { %443 = vmatpush.msra.mxu3 %v361_v15  ;;  %374 = vmatpush.msra.mxu0 %v328_v20  ;;  %v356_v29 = vld [vmem:[%s1080_s6 + $0x190] sm:$0xff]  ;;  %v321_v30 = vld [vmem:[%s1080_s6 + $0x78] sm:$0xff]  ;;  %v322_v32 = vld [vmem:[%s1080_s6 + $0x80] sm:$0xff]  ;;  %p852_p7 = pneg %p851_p6 }
  0x3c   : > { %421 = vmatpush.msra.mxu2 %v327_v18  ;;  %397 = vmatpush.msra.mxu1 %v360_v21  ;;  %v353_v31 = vld [vmem:[%s1080_s6 + $0x178] sm:$0xff]  ;;  %v354_v33 = vld [vmem:[%s1080_s6 + $0x180] sm:$0xff]  ;;  %v319_v34 = vld [vmem:[%s1080_s6 + $0x68] sm:$0xff] }
  0x3d   : > { %444 = vmatpush.msra.mxu3 %v359_v19  ;;  %375 = vmatpush.msra.mxu0 %v326_v24  ;;  %v351_v35 = vld [vmem:[%s1080_s6 + $0x168] sm:$0xff]  ;;  %v320_v36 = vld [vmem:[%s1080_s6 + $0x70] sm:$0xff]  ;;  %v317_v38 = vld [vmem:[%s1080_s6 + $0x58] sm:$0xff]  ;;  %p857_p11 = pnand %p856_p10, %p852_p7 }
  0x3e   : > { %422 = vmatpush.msra.mxu2 %v325_v22  ;;  %398 = vmatpush.msra.mxu1 %v358_v25  ;;  %v352_v37 = vld [vmem:[%s1080_s6 + $0x170] sm:$0xff]  ;;  %v349_v39 = vld [vmem:[%s1080_s6 + $0x158] sm:$0xff]  ;;  %v318_v40 = vld [vmem:[%s1080_s6 + $0x60] sm:$0xff] }
  0x3f   : > { %445 = vmatpush.msra.mxu3 %v357_v23  ;;  %376 = vmatpush.msra.mxu0 %v324_v28  ;;  %v350_v41 = vld [vmem:[%s1080_s6 + $0x160] sm:$0xff]  ;;  %v315_v42 = vld [vmem:[%s1080_s6 + $0x48] sm:$0xff]  ;;  %v316_v44 = vld [vmem:[%s1080_s6 + $0x50] sm:$0xff] }
  0x40   : > { %423 = vmatpush.msra.mxu2 %v323_v26  ;;  %399 = vmatpush.msra.mxu1 %v356_v29  ;;  %v347_v43 = vld [vmem:[%s1080_s6 + $0x148] sm:$0xff]  ;;  %v348_v45 = vld [vmem:[%s1080_s6 + $0x150] sm:$0xff]  ;;  %v313_v46 = vld [vmem:[%s1080_s6 + $0x38] sm:$0xff] }
  0x41   : > { %446 = vmatpush.msra.mxu3 %v355_v27  ;;  %377 = vmatpush.msra.mxu0 %v322_v32  ;;  %v345_v47 = vld [vmem:[%s1080_s6 + $0x138] sm:$0xff]  ;;  %v314_v48 = vld [vmem:[%s1080_s6 + $0x40] sm:$0xff]  ;;  %v311_v50 = vld [vmem:[%s1080_s6 + $0x28] sm:$0xff] }
  0x42   : > { %424 = vmatpush.msra.mxu2 %v321_v30  ;;  %400 = vmatpush.msra.mxu1 %v354_v33  ;;  %v346_v49 = vld [vmem:[%s1080_s6 + $0x140] sm:$0xff]  ;;  %v343_v51 = vld [vmem:[%s1080_s6 + $0x128] sm:$0xff]  ;;  %v312_v52 = vld [vmem:[%s1080_s6 + $0x30] sm:$0xff] }
  0x43   : > { %447 = vmatpush.msra.mxu3 %v353_v31  ;;  %378 = vmatpush.msra.mxu0 %v320_v36  ;;  %v344_v53 = vld [vmem:[%s1080_s6 + $0x130] sm:$0xff]  ;;  %v309_v54 = vld [vmem:[%s1080_s6 + $0x18] sm:$0xff]  ;;  %v310_v56 = vld [vmem:[%s1080_s6 + $0x20] sm:$0xff] }
  0x44   : > { %425 = vmatpush.msra.mxu2 %v319_v34  ;;  %401 = vmatpush.msra.mxu1 %v352_v37  ;;  %v341_v55 = vld [vmem:[%s1080_s6 + $0x118] sm:$0xff]  ;;  %v342_v57 = vld [vmem:[%s1080_s6 + $0x120] sm:$0xff]  ;;  %v307_v58 = vld [vmem:[%s1080_s6 + $0x8] sm:$0xff] }
  0x45   : > { %448 = vmatpush.msra.mxu3 %v351_v35  ;;  %379 = vmatpush.msra.mxu0 %v318_v40  ;;  %v339_v59 = vld [vmem:[%s1080_s6 + $0x108] sm:$0xff]  ;;  %v302_v60 = vld [vmem:[#allocation3] sm:$0xff]  ;;  %v308_v62 = vld [vmem:[%s1080_s6 + $0x10] sm:$0xff] }
  0x46   : > { %426 = vmatpush.msra.mxu2 %v317_v38  ;;  %402 = vmatpush.msra.mxu1 %v350_v41  ;;  %v303_v61 = vld [vmem:[#allocation3 + $0x8] sm:$0xff]  ;;  %v340_v63 = vld [vmem:[%s1080_s6 + $0x110] sm:$0xff]  ;;  %v306_v0 = vld [vmem:[%s1080_s6] sm:$0xff] }
  0x47   : > { %449 = vmatpush.msra.mxu3 %v349_v39  ;;  %380 = vmatpush.msra.mxu0 %v316_v44  ;;  %v338_v1 = vld [vmem:[%s1080_s6 + $0x100] sm:$0xff]  ;;  %v304_v2 = vld [vmem:[#allocation3 + $0x10] sm:$0xff]  ;;  %v305_v3 = vld [vmem:[#allocation3 + $0x18] sm:$0xff] }
  0x48   : > { %427 = vmatpush.msra.mxu2 %v315_v42  ;;  %403 = vmatpush.msra.mxu1 %v348_v45  ;;  %v477_v4 = vld [vmem:[%s254_s10] sm:$0x3] }
  0x49   : > { %450 = vmatpush.msra.mxu3 %v347_v43  ;;  %381 = vmatpush.msra.mxu0 %v314_v48  ;;  %v479_v5 = vperm.slane %v477_v4, 0  ;;  %v480_v9 = vperm.slane %v477_v4, 1 }
  0x4a   : > { %428 = vmatpush.msra.mxu2 %v313_v46  ;;  %404 = vmatpush.msra.mxu1 %v346_v49 }
  0x4b   : > { %451 = vmatpush.msra.mxu3 %v345_v47  ;;  %382 = vmatpush.msra.mxu0 %v312_v52 }
  0x4c   : > { %429 = vmatpush.msra.mxu2 %v311_v50  ;;  %405 = vmatpush.msra.mxu1 %v344_v53 }
  0x4d   : > { %452 = vmatpush.msra.mxu3 %v343_v51  ;;  %383 = vmatpush.msra.mxu0 %v310_v56 }
  0x4e   : > { %430 = vmatpush.msra.mxu2 %v309_v54  ;;  %406 = vmatpush.msra.mxu1 %v342_v57 }
  0x4f   : > { %453 = vmatpush.msra.mxu3 %v341_v55  ;;  %384 = vmatpush.msra.mxu0 %v308_v62 }
  0x50   : > { %431 = vmatpush.msra.mxu2 %v307_v58  ;;  %407 = vmatpush.msra.mxu1 %v340_v63 }
  0x51   : > { %454 = vmatpush.msra.mxu3 %v339_v59  ;;  %432 = vmatmul.f32.vlgmr.msra.gmra.mxu2 %v302_v60 }
  0x52   : > { %455 = vmatmul.f32.vlgmr.msra.gmra.mxu3 %v303_v61  ;;  %385 = vmatpush.msra.mxu0 %v306_v0 }
  0x53   : > { %408 = vmatpush.msra.mxu1 %v338_v1  ;;  %386 = vmatmul.f32.vlgmr.msra.gmra.mxu0 %v302_v60 }
  0x54   : > { %409 = vmatmul.f32.vlgmr.msra.gmra.mxu1 %v303_v61 }
  0x59   : > { %435 = vmatmul.f32.gmra.mxu2 %v304_v2 }
  0x5a   : > { %458 = vmatmul.f32.gmra.mxu3 %v305_v3 }
  0x5b   : > { %389 = vmatmul.f32.gmra.mxu0 %v304_v2 }
  0x5c   : > { %412 = vmatmul.f32.gmra.mxu1 %v305_v3 }
  0xd0   : > { %v387_v6 = vpop.f32.mrf.mxu0 }
  0xd1   : > { %v410_v7 = vpop.f32.mrf.mxu1 }
  0xd2   : > { %v411_v8 = vadd.f32 %v410_v7, %v387_v6 }
  0xd4   : > { %v433_v10 = vpop.f32.mrf.mxu2  ;;  %v483_v12 = vadd.f32 %v479_v5, %v411_v8 }
  0xd5   : > { %v456_v11 = vpop.f32.mrf.mxu3 }
  0xd6   : > { %v457_v13 = vadd.f32 %v456_v11, %v433_v10  ;;  %487 = vst [vmem:[%s282_s27] sm:$0xff] %v483_v12 }
  0xd8   : > { %v484_v14 = vadd.f32 %v480_v9, %v457_v13  ;;  %v390_v15 = vpop.f32.mrf.mxu0 }
  0xd9   : > { %v413_v16 = vpop.f32.mrf.mxu1 }
  0xda   : > { %488 = vst [vmem:[%s282_s27 + $0x8] sm:$0xff] %v484_v14  ;;  %v414_v17 = vadd.f32 %v413_v16, %v390_v15 }
  0xdc   : > { %v436_v18 = vpop.f32.mrf.mxu2  ;;  %v485_v20 = vadd.f32 %v479_v5, %v414_v17 }
  0xdd   : > { %v459_v19 = vpop.f32.mrf.mxu3 }
  0xde   : > { %v460_v21 = vadd.f32 %v459_v19, %v436_v18  ;;  %489 = vst [vmem:[%s282_s27 + $0x10] sm:$0xff] %v485_v20 }
  0xe0   : > { %v486_v22 = vadd.f32 %v480_v9, %v460_v21 }
  0xe2   : > { %490 = vst [vmem:[%s282_s27 + $0x18] sm:$0xff] %v486_v22 }
  0xe3   : > { %860 = shalt.err (!%p857_p11)
}
  0xe4   : > { %s925_s9 = smov 256   ;;  %s926_s6 = smov 768  }
  0xe5   : > { %s927_s7 = smov 16  }
  0xe6   : > { %667 = dma.vmem_to_hbm [thread:$0]  (%p1037_p13), %s508_s4, 512, %s510_s5, %s492_s15, %s925_s9, %s926_s6, %s927_s7  }
  0xe7 PF: > { %p687_p12 = scmp.ge.s32.totalorder %s919_s17, 2  ;;  %s524_s10 = sand.u32 1, %s899_s12  }
  0xe8   : > { %s525_s11 = scalar_lea.sflag [#allocation5], %s524_s10 }
  0xe9   : > { %p681_p2 = pnand %p687_p12, %p1041_p0 }
  0xeb   : > { %p682_p3 = pneg %p681_p2 }
  0xed   : > { %894 = dma.done.wait (%p682_p3), %s525_s11, 512  }
  0xee   : > { %896 = vsyncadd (%p682_p3), %s525_s11, 4294966784  ;;  %s20_s17 = sadd.s32 1, %s919_s17   ;;  %s1207_s12 = smov %s903_s13 }
  0xef   : > { %p17_p1 = scmp.ge.s32.totalorder %s20_s17, 5   ;;  %s1208_s13 = smov %s907_s14 }
  0xf0   : > { %s1209_s14 = smov %s998_s24  ;;  %s1210_s15 = smov %s915_s16 }
  0xf1   : > { %s1211_s16 = smov %s1213_s18  ;;  %19 = sbr.rel (!%p17_p1) target bundleno = 10 (0xa), region = 102 }
  0xf6   :  { %531 = vsyncpa [#allocation4], 1 }
  0xf7   :  { %533 = vsyncpa [#allocation4 + $0x1], 1 }
  0xf8   :  { %534 = vsyncpa [#allocation7], 1 }
  0xf9   :  { %536 = vsyncpa [#allocation7 + $0x1], 1 }
  0xfa   :  { %537 = vsyncpa [#allocation5], 1 }
  0xfb   :  { %539 = vsyncpa [#allocation5 + $0x1], 1 }

</bundles_post_ra>
